<compile_context>
chip_gen: v7x
topology: tpu7x:2x2x1
jax: 0.10.0
libtpu: 0.0.40
codegen_flags: <defaults>
</compile_context>

<pallas_src>
import functools

import jax
import jax.numpy as jnp
from jax.experimental import pallas as pl
from jax.experimental.pallas import tpu as pltpu


def _round_up(x, m):
    return ((x + m - 1) // m) * m


def _weighted_kin_kernel(traj_ref, w_ref, out_ref, *, d):
    """One B-tile of the per-batch weighted kinematic loss (before k-weighting).

    traj_ref : (TB, H*D)  native dtype, lane-dense flattened trajectory
    w_ref    : (H*D, 1)   f32, per-lane weight = t_weights[h]/H (last D lanes 0)
    out_ref  : (TB, 1)    f32, mean_h( loss[b,h] * t_weights[h] ) per batch row
    """
    flat = traj_ref[...].astype(jnp.float32)                 # single in-VMEM upcast
    hd = flat.shape[-1]
    if hd == d:                                              # H == 1: loss is identically 0
        out_ref[...] = jnp.zeros_like(out_ref)
        return
    # nxt[b, h*D + j] = traj[b, h+1, j]; wraps at h = H-1, which is cancelled
    # by the zeroed last-D-lane weights in w_ref. pltpu.roll needs a
    # non-negative axis; rolling right by HD-D == rolling left by D.
    nxt = pltpu.roll(flat, shift=hd - d, axis=1)
    vel = nxt - flat
    vsq = vel * vel                                          # (TB, HD)
    # Weighted lane reduction as one MXU matvec:
    #   out[b] = sum_h (t_w[h]/H) * ||vel[b,h,:]||^2
    out_ref[...] = jnp.dot(vsq, w_ref[...], preferred_element_type=jnp.float32)


def _per_batch_weighted_jax(traj, t_weights):
    """Pure-JAX path: mean_h( ||traj[:,h+1]-traj[:,h]||^2 * t_weights[h] )."""
    B, H, D = traj.shape
    x = traj.astype(jnp.float32)
    vel = x[:, 1:, :] - x[:, :-1, :]
    loss = jnp.concatenate(
        [jnp.sum(vel * vel, axis=-1), jnp.zeros((B, 1), jnp.float32)], axis=1)
    return jnp.mean(loss * t_weights.astype(jnp.float32)[None, :], axis=1)


def weighted_kinematic_loss(traj, k, t_weights, k_weights, *,
                            force_pallas=False,
                            small_fallback_bytes=256 * 1024):
    """JAX/Pallas equivalent of WeightedKinematicLoss.forward(traj, k)."""
    B, H, D = traj.shape
    HD = H * D
    itemsize = jnp.dtype(traj.dtype).itemsize
    total_bytes = B * HD * itemsize

    if (not force_pallas) and total_bytes < small_fallback_bytes:
        # Tiny problem: pallas_call launch + single-step overhead dominate the
        # 4 KB of actual work -> plain JAX is faster.
        per_batch = _per_batch_weighted_jax(traj, t_weights)
    else:
        # Lane-dense flattening (row-major, free): (B, H, D) -> (B, H*D).
        # Keep the native dtype; the kernel upcasts once in VMEM.
        flat = traj.reshape(B, HD)

        # Per-lane weight vector: w[h*D + j] = t_weights[h] / H, with the last
        # horizon step zeroed. This BOTH matches loss[:, -1] == 0 AND cancels
        # the in-kernel roll wrap-around — keep the two coupled.
        t_eff = (t_weights.astype(jnp.float32) / H).at[H - 1].set(0.0)
        w_flat = jnp.repeat(t_eff, D).reshape(HD, 1)

        # Batch-tile sizing from a VMEM byte budget (not a hard row cap):
        #  * ~4 MiB per traj tile -> ~8 MiB double-buffered, under the default
        #    scoped-VMEM limit on v5e (16 MiB) and v6e/v7x (32 MiB).
        #  * Whole batch in one tile -> TB = B (full-extent block, no padding).
        #  * Large single-tile batches split into 2 grid steps for v7x megacore.
        #  * Otherwise TB = budget rows; Pallas masks the trailing partial
        #    block, so no wrapper-side pad copy of traj is ever made.
        tile_budget_bytes = 4 * 1024 * 1024
        tb_budget = max(8, ((tile_budget_bytes // (HD * itemsize)) // 8) * 8)
        if B <= tb_budget:
            if total_bytes >= (2 << 20) and B >= 16:
                TB = _round_up(-(-B // 2), 8)   # >= 2 grid steps for v7x's 2 TCs
            else:
                TB = B                          # single full-extent block
        else:
            TB = tb_budget

        grid = (pl.cdiv(B, TB),)

        out = pl.pallas_call(
            functools.partial(_weighted_kin_kernel, d=D),
            out_shape=jax.ShapeDtypeStruct((B, 1), jnp.float32),
            grid=grid,
            in_specs=[
                pl.BlockSpec((TB, HD), lambda i: (i, 0)),    # traj tile (streamed)
                pl.BlockSpec((HD, 1), lambda i: (0, 0)),     # weight vec (resident)
            ],
            out_specs=pl.BlockSpec((TB, 1), lambda i: (i, 0)),
            compiler_params=pltpu.CompilerParams(
                dimension_semantics=("parallel",)),          # shards B across v7x TCs
            cost_estimate=pl.CostEstimate(
                flops=3 * B * HD,
                transcendentals=0,
                bytes_accessed=total_bytes + HD * 4 + B * 4),
        )(flat, w_flat)
        per_batch = out[:, 0]                                # (B,)

    # Per-batch diffusion-step weight + the tiny [B]-vector bookkeeping are
    # scalar glue and stay in plain JAX (matches the PyTorch forward's info dict).
    kw = k_weights[k].astype(jnp.float32)                    # (B,)
    weighted_loss = per_batch * kw

    max_index = jnp.argmax(weighted_loss)
    # Matches torch.where(k_weights[k] != 0, weighted_loss, 1e10).argmin().
    # If every kw[b] == 0 this picks index 0 (pre-existing module behavior).
    min_index = jnp.argmin(jnp.where(kw != 0, weighted_loss, 1e10))
    mean_loss = jnp.mean(weighted_loss)

    info = {
        "kin_loss": mean_loss,
        "max_loss": weighted_loss[max_index],
        "min_loss": weighted_loss[min_index],
        "k_max_loss": k[max_index],
        "k_min_loss": k[min_index],
        "k_min": k.min(),
        "k_max": k.max(),
    }
    return mean_loss, info


def _reference(traj, k, t_weights, k_weights):
    """Pure-JAX reference for correctness checking."""
    vel = traj[:, 1:, :] - traj[:, :-1, :]
    loss = jnp.concatenate(
        [jnp.sum(vel * vel, axis=-1), jnp.zeros((traj.shape[0], 1))], axis=1
    )
    weighted = jnp.mean(loss * t_weights[None, :], axis=1) * k_weights[k]
    return weighted


if __name__ == "__main__":
    key = jax.random.PRNGKey(0)
    k1, k2 = jax.random.split(key)

    B, H, D = 8, 16, 8           # batch x horizon x transition_dim  (H*D = 128)
    T = 10                       # number of diffusion timesteps

    traj = jax.random.normal(k1, (B, H, D), dtype=jnp.float32)
    k = jax.random.randint(k2, (B,), 0, T, dtype=jnp.int32)

    # Deterministic buffer initialization (the module only stores buffers).
    t_weights = jnp.linspace(1.0, 2.0, H, dtype=jnp.float32)           # [H]
    k_weights = 0.9 ** jnp.arange(T, dtype=jnp.float32)                # [T]
    k_weights = k_weights.at[0].set(0.0)  # make the !=0 masking path meaningful

    # force_pallas=True so the Pallas kernel actually runs at this tiny shape
    # (the default wrapper policy would route <256 KB inputs to plain JAX).
    mean_loss, info = weighted_kinematic_loss(
        traj, k, t_weights, k_weights, force_pallas=True)
    jax.block_until_ready(mean_loss)
    jax.block_until_ready(info)

    # Sanity check against pure-JAX reference.
    ref_weighted = _reference(traj, k, t_weights, k_weights)
    assert jnp.allclose(mean_loss, jnp.mean(ref_weighted), atol=1e-5, rtol=1e-5)
    assert jnp.allclose(info["max_loss"], ref_weighted.max(), atol=1e-5, rtol=1e-5)
    kw = k_weights[k]
    ref_min = jnp.where(kw != 0, ref_weighted, 1e10).min()
    assert jnp.allclose(info["min_loss"], ref_min, atol=1e-5, rtol=1e-5)

    print("KERNEL_OK")
</pallas_src>

<mosaic_0001>
module attributes {stable_mosaic.version = 11 : i64} {
  func.func @_weighted_kin_kernel(%arg0: i32, %arg1: memref<8x128xf32, #tpu.memory_space<vmem>>, %arg2: memref<128x1xf32, #tpu.memory_space<vmem>>, %arg3: memref<8x1xf32, #tpu.memory_space<vmem>>) attributes {dimension_semantics = [#tpu.dimension_semantics<parallel>], iteration_bounds = array<i64: 1>, scalar_prefetch = 0 : i64, scratch_operands = 0 : i64, tpu.core_type = #tpu.core_type<tc>, window_params = [{transform_indices = @transform_0, window_bounds = array<i64: 8, 128>}, {pipeline_mode = #tpu.pipeline_mode<synchronous>, transform_indices = @transform_1, window_bounds = array<i64: 128, 1>}, {transform_indices = @transform_2, window_bounds = array<i64: 8, 1>}]} {
    %c0 = arith.constant 0 : index
    %c0_0 = arith.constant 0 : index
    %0 = vector.load %arg1[%c0, %c0_0] : memref<8x128xf32, #tpu.memory_space<vmem>>, vector<8x128xf32>
    %c120_i32 = arith.constant 120 : i32
    %1 = tpu.dynamic_rotate %0 by %c120_i32 dim 1 : vector<8x128xf32>, i32 -> vector<8x128xf32>
    %2 = arith.subf %1, %0 : vector<8x128xf32>
    %3 = arith.mulf %2, %2 : vector<8x128xf32>
    %c0_1 = arith.constant 0 : index
    %c0_2 = arith.constant 0 : index
    %4 = vector.load %arg2[%c0_1, %c0_2] : memref<128x1xf32, #tpu.memory_space<vmem>>, vector<128x1xf32>
    %cst = arith.constant dense<0.000000e+00> : vector<8x1xf32>
    %5 = tpu.matmul %3, %4, %cst {dimension_numbers = #tpu.dot_dimension_numbers<[1], [0], [0], [1], [0, 0, 1, 1], [], []>} : vector<8x128xf32>, vector<128x1xf32>, vector<8x1xf32> -> vector<8x1xf32>
    %c0_3 = arith.constant 0 : index
    %c0_4 = arith.constant 0 : index
    %6 = vector.load %arg3[%c0_3, %c0_4] : memref<8x1xf32, #tpu.memory_space<vmem>>, vector<8x1xf32>
    tpu.vector_store %arg3[%c0_3, %c0_4], %5 {strides = array<i32>} : memref<8x1xf32, #tpu.memory_space<vmem>>, vector<8x1xf32>,
    return
  }
  func.func @transform_0(%arg0: i32) -> (i32, i32) {
    %c0_i32 = arith.constant 0 : i32
    %c0_i32_0 = arith.constant 0 : i32
    return %arg0, %c0_i32 : i32, i32
  }
  func.func @transform_1(%arg0: i32) -> (i32, i32) {
    %c0_i32 = arith.constant 0 : i32
    %c0_i32_0 = arith.constant 0 : i32
    %c0_i32_1 = arith.constant 0 : i32
    return %c0_i32, %c0_i32_0 : i32, i32
  }
  func.func @transform_2(%arg0: i32) -> (i32, i32) {
    %c0_i32 = arith.constant 0 : i32
    %c0_i32_0 = arith.constant 0 : i32
    return %arg0, %c0_i32 : i32, i32
  }
}

</mosaic_0001>

<bundles_post_ra>
// kernel: tpu_custom_call.1
= control target key start
LH: loop header
LB: loop body
LE: loop exit
PB: predicated region body
PF: predicated region fallthrough
CT: control target
= control target key end

     0   :  { %v188_v1 = vmov 0.0|0.0   ;;  %vm189_vm0 = vmmov 0   ;;  %v190_v4 = vmov 0.0   ;;  %s191_s15 = smov 120   ;;  %vm102_vm1 = vcmask 7168   ;;  %s261_s0 = inlined_call_operand.vmem [shape: f32[8,128], index: 0, kind: input, shape index: {}]   ;;  %s262_s1 = inlined_call_operand.vmem [shape: f32[128,1], index: 1, kind: input, shape index: {}]   ;;  %s263_s2 = inlined_call_operand.vmem [shape: f32[8,1], index: 2, kind: output, shape index: {}]  }
   0x1   :  { %v11_v0 = vld [vmem:[%s261_s0] sm:$0xff]  ;;  %160 = vmatprep.subr.bf16.mxu0 %v188_v1  ;;  %v17_v3 = vld [vmem:[%s262_s1 + $0x8] sm:$0xff]  ;;  %157 = vmatprep.mubr.msk.f32.mxu0 %vm189_vm0, %v190_v4  ;;  %v18_v6 = vld [vmem:[%s262_s1 + $0x10] sm:$0xff] }
   0x2   :  { %v16_v2 = vld [vmem:[%s262_s1] sm:$0xff]  ;;  %12 = vrot.lane.b32.xlu0 %v11_v0, %s191_s15  ;;  %v19_v7 = vld [vmem:[%s262_s1 + $0x18] sm:$0xff]  ;;  %v21_v10 = vld [vmem:[%s262_s1 + $0x28] sm:$0xff] }
   0x3   :  { %v161_v5 = vpack.c.bf16 %v17_v3, %v16_v2  ;;  %v164_v8 = vpack.c.bf16 %v19_v7, %v18_v6  ;;  %v20_v9 = vld [vmem:[%s262_s1 + $0x20] sm:$0xff]  ;;  %v22_v12 = vld [vmem:[%s262_s1 + $0x30] sm:$0xff]  ;;  %v23_v13 = vld [vmem:[%s262_s1 + $0x38] sm:$0xff] }
   0x4   :  { %v167_v11 = vpack.c.bf16 %v21_v10, %v20_v9  ;;  %v170_v14 = vpack.c.bf16 %v23_v13, %v22_v12  ;;  %v24_v15 = vld [vmem:[%s262_s1 + $0x40] sm:$0xff]  ;;  %v25_v16 = vld [vmem:[%s262_s1 + $0x48] sm:$0xff]  ;;  %v26_v18 = vld [vmem:[%s262_s1 + $0x50] sm:$0xff] }
   0x5   :  { %162 = vmatpush3.bf16.msra.mxu0 %v161_v5  ;;  %v173_v17 = vpack.c.bf16 %v25_v16, %v24_v15  ;;  %v27_v19 = vld [vmem:[%s262_s1 + $0x58] sm:$0xff]  ;;  %v28_v21 = vld [vmem:[%s262_s1 + $0x60] sm:$0xff]  ;;  %v29_v22 = vld [vmem:[%s262_s1 + $0x68] sm:$0xff] }
   0x6   :  { %163 = vmatprep.subr.bf16.mxu0 %v188_v1  ;;  %v176_v20 = vpack.c.bf16 %v27_v19, %v26_v18  ;;  %v179_v23 = vpack.c.bf16 %v29_v22, %v28_v21  ;;  %v30_v24 = vld [vmem:[%s262_s1 + $0x70] sm:$0xff]  ;;  %v31_v25 = vld [vmem:[%s262_s1 + $0x78] sm:$0xff] }
   0x7   :  { %v182_v26 = vpack.c.bf16 %v31_v25, %v30_v24 }
   0x9   :  { %165 = vmatpush3.bf16.msra.mxu0 %v164_v8 }
   0xa   :  { %166 = vmatprep.subr.bf16.mxu0 %v188_v1 }
   0xd   :  { %168 = vmatpush3.bf16.msra.mxu0 %v167_v11 }
   0xe   :  { %169 = vmatprep.subr.bf16.mxu0 %v188_v1 }
  0x11   :  { %171 = vmatpush3.bf16.msra.mxu0 %v170_v14 }
  0x12   :  { %172 = vmatprep.subr.bf16.mxu0 %v188_v1 }
  0x15   :  { %174 = vmatpush3.bf16.msra.mxu0 %v173_v17 }
  0x16   :  { %175 = vmatprep.subr.bf16.mxu0 %v188_v1 }
  0x19   :  { %177 = vmatpush3.bf16.msra.mxu0 %v176_v20 }
  0x1a   :  { %178 = vmatprep.subr.bf16.mxu0 %v188_v1 }
  0x1d   :  { %180 = vmatpush3.bf16.msra.mxu0 %v179_v23 }
  0x1e   :  { %181 = vmatprep.subr.bf16.mxu0 %v188_v1 }
  0x21   :  { %183 = vmatpush3.bf16.msra.mxu0 %v182_v26 }
  0x74   :  { %v13_v27 = vpop.permute.xlu0 %12 }
  0x75   :  { %v14_v28 = vsub.f32 %v13_v27, %v11_v0 }
  0x77   :  { %v15_v29 = vmul.f32 %v14_v28, %v14_v28 }
  0x79   :  { %158 = vmatmul.mubr.f32.vlgmr.msra.gmra.mrb[0].mxu0 %v15_v29 }
 0x14c   :  { %v98_v30 = vpop.f32.mrb[0].mxu0 }
 0x14d   :  { %103 = vst.msk [vmem:[%s263_s2] sm:$0xff] %vm102_vm1, %v98_v30  ;;  %v159_v31 = vpop.f32.mrb[1].mxu0 }

</bundles_post_ra>
